<compile_context>
chip_gen: v5e
topology: v5e:2x2
jax: 0.10.0
libtpu: 0.0.40
codegen_flags: <defaults>
</compile_context>

<pallas_src>
import math

import jax
import jax.numpy as jnp
from jax import lax
from jax.experimental import pallas as pl
from jax.experimental.pallas import tpu as pltpu


def _make_basic_kernel(H, W, C, C1, C2):
    N = H * W              # flat spatial size (lane axis)
    P = W + 1              # left/right zero-halo width of the flat padded buffers
    LP = N + 2 * P         # padded flat length

    def kernel(alpha_ref, x_ref, w1_ref, b1_ref, w2_ref, b2_ref, o_ref, hp_ref):
        # alpha_ref: (1, 1) SMEM        shared PReLU parameter
        # x_ref    : (1, C, LP)  VMEM   flat, spatially zero-padded input (channels-first)
        # w*_ref   : (9, Cout, Cin)     per-tap weight matrices; b*_ref: (Cout, 1)
        # o_ref    : (1, C2, N)         lane-dense output block (N = 256 lanes)
        # hp_ref   : (C1, LP)    VMEM   scratch: zero-padded conv1 output

        # Column masks: a tap that reads column x-1 (kx==0) is invalid at x==0,
        # and a tap reading column x+1 (kx==2) is invalid at x==W-1.  Vertical
        # padding is already materialised as the (W+1)-wide zero halos, so only
        # these two horizontal masks are needed.
        col = lax.broadcasted_iota(jnp.int32, (1, N), 1) % W
        cmask = (
            (col > 0).astype(jnp.float32),       # kx == 0
            None,                                # kx == 1 (no mask)
            (col < W - 1).astype(jnp.float32),   # kx == 2
        )

        def conv3x3(read_patch, w_ref, b_ref, cout):
            acc = jnp.zeros((cout, N), jnp.float32)
            for ky in range(3):
                for kx in range(3):
                    s = ky * W + kx                       # fixed flat tap offset
                    t = jnp.dot(w_ref[3 * ky + kx], read_patch(s),
                                preferred_element_type=jnp.float32)
                    m = cmask[kx]
                    acc = acc + (t if m is None else t * m)
            return acc + b_ref[...]                       # (cout, 1) broadcasts over lanes

        # ---- conv1: taps are (C, N) loads from the padded input at fixed offsets ----
        acc1 = conv3x3(lambda s: x_ref[0, :, s:s + N], w1_ref, b1_ref, C1)

        # ---- PReLU (single shared parameter) ----
        a = alpha_ref[0, 0]
        h = jnp.where(acc1 >= 0, acc1, a * acc1)

        # ---- stage zero-padded intermediate for conv2 ----
        # Invariant: only the interior ever receives data and it is fully
        # overwritten every grid step; the halo bands are (re)zeroed every step
        # (they are tiny), so the persistent scratch is always consistent even
        # with the "parallel" batch axis.
        hp_ref[:, :P] = jnp.zeros((C1, P), jnp.float32)
        hp_ref[:, P + N:] = jnp.zeros((C1, P), jnp.float32)
        hp_ref[:, P:P + N] = h

        # ---- conv2 + bias + skip (Identity; requires C == C2) ----
        acc2 = conv3x3(lambda s: hp_ref[:, s:s + N], w2_ref, b2_ref, C2)
        o_ref[0] = (acc2 + x_ref[0, :, P:P + N]).astype(o_ref.dtype)

    return kernel, LP


@jax.jit
def basic_forward(x_nchw, w1_hwio, b1, alpha, w2_hwio, b2):
    """x_nchw: (B, C, H, W) float32; conv weights in HWIO (3,3,Cin,Cout). Returns NCHW."""
    x = x_nchw.astype(jnp.float32)
    B, C, H, W = x.shape
    C1 = w1_hwio.shape[3]
    C2 = w2_hwio.shape[3]
    assert C == C2, "skip connection is Identity only when intIn == intOut"

    N = H * W
    P = W + 1
    kernel, LP = _make_basic_kernel(H, W, C, C1, C2)

    # Channels-first flat layout (no NCHW<->NHWC transposes).  One small pad
    # provides the vertical zero rows plus the +-1 slack for horizontal taps.
    xp = jnp.pad(x.reshape(B, C, N), ((0, 0), (0, 0), (P, P)))

    # Per-tap (Cout, Cin) matrices: w_t[ky*3+kx, co, ci] = w_hwio[ky, kx, ci, co].
    w1_t = jnp.transpose(w1_hwio, (0, 1, 3, 2)).reshape(9, C1, C).astype(jnp.float32)
    w2_t = jnp.transpose(w2_hwio, (0, 1, 3, 2)).reshape(9, C2, C1).astype(jnp.float32)
    b1r = b1.reshape(C1, 1).astype(jnp.float32)
    b2r = b2.reshape(C2, 1).astype(jnp.float32)
    alpha2 = jnp.reshape(alpha, (1, 1)).astype(jnp.float32)

    out = pl.pallas_call(
        kernel,
        out_shape=jax.ShapeDtypeStruct((B, C2, N), jnp.float32),
        grid_spec=pltpu.PrefetchScalarGridSpec(
            num_scalar_prefetch=0,
            grid=(B,),
            in_specs=[
                pl.BlockSpec(memory_space=pltpu.MemorySpace.SMEM),      # alpha
                pl.BlockSpec((1, C, LP), lambda b: (b, 0, 0)),          # x (padded, flat)
                pl.BlockSpec((9, C1, C), lambda b: (0, 0, 0)),          # w1 taps
                pl.BlockSpec((C1, 1), lambda b: (0, 0)),                # b1
                pl.BlockSpec((9, C2, C1), lambda b: (0, 0, 0)),         # w2 taps
                pl.BlockSpec((C2, 1), lambda b: (0, 0)),                # b2
            ],
            out_specs=pl.BlockSpec((1, C2, N), lambda b: (b, 0, 0)),
            scratch_shapes=[pltpu.VMEM((C1, LP), jnp.float32)],
        ),
        compiler_params=pltpu.CompilerParams(
            dimension_semantics=("parallel",)),    # batch -> both TCs on v7x
    )(alpha2, xp, w1_t, b1r, w2_t, b2r)

    return out.reshape(B, C2, H, W)


def ref_forward(x_nchw, w1_hwio, b1, alpha, w2_hwio, b2):
    """Pure-JAX reference matching the PyTorch module semantics (NCHW)."""
    dn = ('NCHW', 'HWIO', 'NCHW')
    y = lax.conv_general_dilated(x_nchw, w1_hwio, (1, 1), 'SAME', dimension_numbers=dn)
    y = y + b1.reshape(1, -1, 1, 1)
    y = jnp.where(y >= 0, y, alpha * y)
    y = lax.conv_general_dilated(y, w2_hwio, (1, 1), 'SAME', dimension_numbers=dn)
    y = y + b2.reshape(1, -1, 1, 1)
    return y + x_nchw


if __name__ == "__main__":
    key = jax.random.PRNGKey(0)
    B, C, H, W = 2, 4, 16, 16     # Basic('conv-prelu(0.25)-conv+skip', [4, 8, 4])
    C1 = 8

    k1, k2, k3, k4, k5 = jax.random.split(key, 5)
    x = jax.random.normal(k1, (B, C, H, W), jnp.float32)

    fan1 = C * 9
    w1 = jax.random.uniform(k2, (3, 3, C, C1), jnp.float32, -1.0, 1.0) / math.sqrt(fan1)
    b1 = jax.random.uniform(k3, (C1,), jnp.float32, -1.0, 1.0) / math.sqrt(fan1)
    fan2 = C1 * 9
    w2 = jax.random.uniform(k4, (3, 3, C1, C), jnp.float32, -1.0, 1.0) / math.sqrt(fan2)
    b2 = jax.random.uniform(k5, (C,), jnp.float32, -1.0, 1.0) / math.sqrt(fan2)
    alpha = jnp.float32(0.25)     # from 'prelu(0.25)'

    out = jax.block_until_ready(basic_forward(x, w1, b1, alpha, w2, b2))
    ref = ref_forward(x, w1, b1, alpha, w2, b2)

    assert out.shape == (B, C, H, W), out.shape
    err = float(jnp.max(jnp.abs(out - ref)))
    assert jnp.allclose(out, ref, atol=2e-4, rtol=2e-4), err
    print("KERNEL_OK")
</pallas_src>

<mosaic_0001>
module attributes {stable_mosaic.version = 11 : i64} {
  func.func @kernel(%arg0: i32, %arg1: memref<1x1xf32, #tpu.memory_space<smem>>, %arg2: memref<1x4x290xf32, #tpu.memory_space<vmem>>, %arg3: memref<9x8x4xf32, #tpu.memory_space<vmem>>, %arg4: memref<8x1xf32, #tpu.memory_space<vmem>>, %arg5: memref<9x4x8xf32, #tpu.memory_space<vmem>>, %arg6: memref<4x1xf32, #tpu.memory_space<vmem>>, %arg7: memref<1x4x256xf32, #tpu.memory_space<vmem>>, %arg8: memref<8x290xf32, #tpu.memory_space<vmem>>) attributes {dimension_semantics = [#tpu.dimension_semantics<parallel>], iteration_bounds = array<i64: 2>, scalar_prefetch = 0 : i64, scratch_operands = 1 : i64, tpu.core_type = #tpu.core_type<tc>, window_params = [{transform_indices = @transform_0, window_bounds = array<i64: 1, 1>}, {transform_indices = @transform_1, window_bounds = array<i64: 1, 4, 290>}, {pipeline_mode = #tpu.pipeline_mode<synchronous>, transform_indices = @transform_2, window_bounds = array<i64: 9, 8, 4>}, {pipeline_mode = #tpu.pipeline_mode<synchronous>, transform_indices = @transform_3, window_bounds = array<i64: 8, 1>}, {pipeline_mode = #tpu.pipeline_mode<synchronous>, transform_indices = @transform_4, window_bounds = array<i64: 9, 4, 8>}, {pipeline_mode = #tpu.pipeline_mode<synchronous>, transform_indices = @transform_5, window_bounds = array<i64: 4, 1>}, {transform_indices = @transform_6, window_bounds = array<i64: 1, 4, 256>}]} {
    %0 = tpu.iota {dimensions = array<i32: 1>} : vector<1x256xi32>
    %c16_i32 = arith.constant 16 : i32
    %c0_i32 = arith.constant 0 : i32
    %1 = arith.cmpi eq, %c16_i32, %c0_i32 : i32
    %c1_i32 = arith.constant 1 : i32
    %2 = arith.select %1, %c1_i32, %c16_i32 : i32
    %3 = vector.broadcast %2 : i32 to vector<1x256xi32>
    %4 = arith.remsi %0, %3 : vector<1x256xi32>
    %c0_i32_0 = arith.constant 0 : i32
    %5 = vector.broadcast %c0_i32_0 : i32 to vector<1x256xi32>
    %6 = arith.cmpi ne, %4, %5 : vector<1x256xi32>
    %c0_i32_1 = arith.constant 0 : i32
    %7 = vector.broadcast %c0_i32_1 : i32 to vector<1x256xi32>
    %8 = arith.cmpi slt, %4, %7 : vector<1x256xi32>
    %c0_i32_2 = arith.constant 0 : i32
    %9 = arith.cmpi slt, %2, %c0_i32_2 : i32
    %10 = vector.broadcast %9 : i1 to vector<1x256xi1>
    %11 = vector.broadcast %10 : vector<1x256xi1> to vector<1x256xi1>
    %12 = arith.xori %8, %11 : vector<1x256xi1>
    %13 = arith.andi %12, %6 : vector<1x256xi1>
    %14 = vector.broadcast %2 : i32 to vector<1x256xi32>
    %15 = arith.addi %4, %14 : vector<1x256xi32>
    %16 = arith.select %13, %15, %4 : vector<1x256xi1>, vector<1x256xi32>
    %c0_i32_3 = arith.constant 0 : i32
    %17 = vector.broadcast %c0_i32_3 : i32 to vector<1x256xi32>
    %18 = arith.cmpi sgt, %16, %17 : vector<1x256xi32>
    %19 = arith.extui %18 : vector<1x256xi1> to vector<1x256xi32>
    %20 = arith.sitofp %19 : vector<1x256xi32> to vector<1x256xf32>
    %c15_i32 = arith.constant 15 : i32
    %21 = vector.broadcast %c15_i32 : i32 to vector<1x256xi32>
    %22 = arith.cmpi slt, %16, %21 : vector<1x256xi32>
    %23 = arith.extui %22 : vector<1x256xi1> to vector<1x256xi32>
    %24 = arith.sitofp %23 : vector<1x256xi32> to vector<1x256xf32>
    %cst = arith.constant 0.000000e+00 : f32
    %25 = vector.broadcast %cst : f32 to vector<8x256xf32>
    %c0 = arith.constant 0 : index
    %c0_4 = arith.constant 0 : index
    %c0_5 = arith.constant 0 : index
    %26 = vector.load %arg3[%c0, %c0_4, %c0_5] : memref<9x8x4xf32, #tpu.memory_space<vmem>>, vector<1x8x4xf32>
    %27 = vector.shape_cast %26 : vector<1x8x4xf32> to vector<8x4xf32>
    %c0_6 = arith.constant 0 : index
    %c0_7 = arith.constant 0 : index
    %c0_8 = arith.constant 0 : index
    %28 = vector.load %arg2[%c0_6, %c0_7, %c0_8] : memref<1x4x290xf32, #tpu.memory_space<vmem>>, vector<1x4x256xf32>
    %29 = vector.shape_cast %28 : vector<1x4x256xf32> to vector<4x256xf32>
    %cst_9 = arith.constant dense<0.000000e+00> : vector<8x256xf32>
    %30 = tpu.matmul %27, %29, %cst_9 {dimension_numbers = #tpu.dot_dimension_numbers<[1], [0], [0], [1], [0, 0, 1, 1], [], []>} : vector<8x4xf32>, vector<4x256xf32>, vector<8x256xf32> -> vector<8x256xf32>
    %31 = vector.broadcast %20 : vector<1x256xf32> to vector<8x256xf32>
    %32 = arith.mulf %30, %31 : vector<8x256xf32>
    %33 = arith.addf %25, %32 : vector<8x256xf32>
    %c1 = arith.constant 1 : index
    %c0_10 = arith.constant 0 : index
    %c0_11 = arith.constant 0 : index
    %34 = vector.load %arg3[%c1, %c0_10, %c0_11] : memref<9x8x4xf32, #tpu.memory_space<vmem>>, vector<1x8x4xf32>
    %35 = vector.shape_cast %34 : vector<1x8x4xf32> to vector<8x4xf32>
    %c0_12 = arith.constant 0 : index
    %c0_13 = arith.constant 0 : index
    %c1_14 = arith.constant 1 : index
    %36 = vector.load %arg2[%c0_12, %c0_13, %c1_14] : memref<1x4x290xf32, #tpu.memory_space<vmem>>, vector<1x4x256xf32>
    %37 = vector.shape_cast %36 : vector<1x4x256xf32> to vector<4x256xf32>
    %cst_15 = arith.constant dense<0.000000e+00> : vector<8x256xf32>
    %38 = tpu.matmul %35, %37, %cst_15 {dimension_numbers = #tpu.dot_dimension_numbers<[1], [0], [0], [1], [0, 0, 1, 1], [], []>} : vector<8x4xf32>, vector<4x256xf32>, vector<8x256xf32> -> vector<8x256xf32>
    %39 = arith.addf %33, %38 : vector<8x256xf32>
    %c2 = arith.constant 2 : index
    %c0_16 = arith.constant 0 : index
    %c0_17 = arith.constant 0 : index
    %40 = vector.load %arg3[%c2, %c0_16, %c0_17] : memref<9x8x4xf32, #tpu.memory_space<vmem>>, vector<1x8x4xf32>
    %41 = vector.shape_cast %40 : vector<1x8x4xf32> to vector<8x4xf32>
    %c0_18 = arith.constant 0 : index
    %c0_19 = arith.constant 0 : index
    %c2_20 = arith.constant 2 : index
    %42 = vector.load %arg2[%c0_18, %c0_19, %c2_20] : memref<1x4x290xf32, #tpu.memory_space<vmem>>, vector<1x4x256xf32>
    %43 = vector.shape_cast %42 : vector<1x4x256xf32> to vector<4x256xf32>
    %cst_21 = arith.constant dense<0.000000e+00> : vector<8x256xf32>
    %44 = tpu.matmul %41, %43, %cst_21 {dimension_numbers = #tpu.dot_dimension_numbers<[1], [0], [0], [1], [0, 0, 1, 1], [], []>} : vector<8x4xf32>, vector<4x256xf32>, vector<8x256xf32> -> vector<8x256xf32>
    %45 = vector.broadcast %24 : vector<1x256xf32> to vector<8x256xf32>
    %46 = arith.mulf %44, %45 : vector<8x256xf32>
    %47 = arith.addf %39, %46 : vector<8x256xf32>
    %c3 = arith.constant 3 : index
    %c0_22 = arith.constant 0 : index
    %c0_23 = arith.constant 0 : index
    %48 = vector.load %arg3[%c3, %c0_22, %c0_23] : memref<9x8x4xf32, #tpu.memory_space<vmem>>, vector<1x8x4xf32>
    %49 = vector.shape_cast %48 : vector<1x8x4xf32> to vector<8x4xf32>
    %c0_24 = arith.constant 0 : index
    %c0_25 = arith.constant 0 : index
    %c16 = arith.constant 16 : index
    %50 = vector.load %arg2[%c0_24, %c0_25, %c16] : memref<1x4x290xf32, #tpu.memory_space<vmem>>, vector<1x4x256xf32>
    %51 = vector.shape_cast %50 : vector<1x4x256xf32> to vector<4x256xf32>
    %cst_26 = arith.constant dense<0.000000e+00> : vector<8x256xf32>
    %52 = tpu.matmul %49, %51, %cst_26 {dimension_numbers = #tpu.dot_dimension_numbers<[1], [0], [0], [1], [0, 0, 1, 1], [], []>} : vector<8x4xf32>, vector<4x256xf32>, vector<8x256xf32> -> vector<8x256xf32>
    %53 = vector.broadcast %20 : vector<1x256xf32> to vector<8x256xf32>
    %54 = arith.mulf %52, %53 : vector<8x256xf32>
    %55 = arith.addf %47, %54 : vector<8x256xf32>
    %c4 = arith.constant 4 : index
    %c0_27 = arith.constant 0 : index
    %c0_28 = arith.constant 0 : index
    %56 = vector.load %arg3[%c4, %c0_27, %c0_28] : memref<9x8x4xf32, #tpu.memory_space<vmem>>, vector<1x8x4xf32>
    %57 = vector.shape_cast %56 : vector<1x8x4xf32> to vector<8x4xf32>
    %c0_29 = arith.constant 0 : index
    %c0_30 = arith.constant 0 : index
    %c17 = arith.constant 17 : index
    %58 = vector.load %arg2[%c0_29, %c0_30, %c17] : memref<1x4x290xf32, #tpu.memory_space<vmem>>, vector<1x4x256xf32>
    %59 = vector.shape_cast %58 : vector<1x4x256xf32> to vector<4x256xf32>
    %cst_31 = arith.constant dense<0.000000e+00> : vector<8x256xf32>
    %60 = tpu.matmul %57, %59, %cst_31 {dimension_numbers = #tpu.dot_dimension_numbers<[1], [0], [0], [1], [0, 0, 1, 1], [], []>} : vector<8x4xf32>, vector<4x256xf32>, vector<8x256xf32> -> vector<8x256xf32>
    %61 = arith.addf %55, %60 : vector<8x256xf32>
    %c5 = arith.constant 5 : index
    %c0_32 = arith.constant 0 : index
    %c0_33 = arith.constant 0 : index
    %62 = vector.load %arg3[%c5, %c0_32, %c0_33] : memref<9x8x4xf32, #tpu.memory_space<vmem>>, vector<1x8x4xf32>
    %63 = vector.shape_cast %62 : vector<1x8x4xf32> to vector<8x4xf32>
    %c0_34 = arith.constant 0 : index
    %c0_35 = arith.constant 0 : index
    %c18 = arith.constant 18 : index
    %64 = vector.load %arg2[%c0_34, %c0_35, %c18] : memref<1x4x290xf32, #tpu.memory_space<vmem>>, vector<1x4x256xf32>
    %65 = vector.shape_cast %64 : vector<1x4x256xf32> to vector<4x256xf32>
    %cst_36 = arith.constant dense<0.000000e+00> : vector<8x256xf32>
    %66 = tpu.matmul %63, %65, %cst_36 {dimension_numbers = #tpu.dot_dimension_numbers<[1], [0], [0], [1], [0, 0, 1, 1], [], []>} : vector<8x4xf32>, vector<4x256xf32>, vector<8x256xf32> -> vector<8x256xf32>
    %67 = vector.broadcast %24 : vector<1x256xf32> to vector<8x256xf32>
    %68 = arith.mulf %66, %67 : vector<8x256xf32>
    %69 = arith.addf %61, %68 : vector<8x256xf32>
    %c6 = arith.constant 6 : index
    %c0_37 = arith.constant 0 : index
    %c0_38 = arith.constant 0 : index
    %70 = vector.load %arg3[%c6, %c0_37, %c0_38] : memref<9x8x4xf32, #tpu.memory_space<vmem>>, vector<1x8x4xf32>
    %71 = vector.shape_cast %70 : vector<1x8x4xf32> to vector<8x4xf32>
    %c0_39 = arith.constant 0 : index
    %c0_40 = arith.constant 0 : index
    %c32 = arith.constant 32 : index
    %72 = vector.load %arg2[%c0_39, %c0_40, %c32] : memref<1x4x290xf32, #tpu.memory_space<vmem>>, vector<1x4x256xf32>
    %73 = vector.shape_cast %72 : vector<1x4x256xf32> to vector<4x256xf32>
    %cst_41 = arith.constant dense<0.000000e+00> : vector<8x256xf32>
    %74 = tpu.matmul %71, %73, %cst_41 {dimension_numbers = #tpu.dot_dimension_numbers<[1], [0], [0], [1], [0, 0, 1, 1], [], []>} : vector<8x4xf32>, vector<4x256xf32>, vector<8x256xf32> -> vector<8x256xf32>
    %75 = vector.broadcast %20 : vector<1x256xf32> to vector<8x256xf32>
    %76 = arith.mulf %74, %75 : vector<8x256xf32>
    %77 = arith.addf %69, %76 : vector<8x256xf32>
    %c7 = arith.constant 7 : index
    %c0_42 = arith.constant 0 : index
    %c0_43 = arith.constant 0 : index
    %78 = vector.load %arg3[%c7, %c0_42, %c0_43] : memref<9x8x4xf32, #tpu.memory_space<vmem>>, vector<1x8x4xf32>
    %79 = vector.shape_cast %78 : vector<1x8x4xf32> to vector<8x4xf32>
    %c0_44 = arith.constant 0 : index
    %c0_45 = arith.constant 0 : index
    %c33 = arith.constant 33 : index
    %80 = vector.load %arg2[%c0_44, %c0_45, %c33] : memref<1x4x290xf32, #tpu.memory_space<vmem>>, vector<1x4x256xf32>
    %81 = vector.shape_cast %80 : vector<1x4x256xf32> to vector<4x256xf32>
    %cst_46 = arith.constant dense<0.000000e+00> : vector<8x256xf32>
    %82 = tpu.matmul %79, %81, %cst_46 {dimension_numbers = #tpu.dot_dimension_numbers<[1], [0], [0], [1], [0, 0, 1, 1], [], []>} : vector<8x4xf32>, vector<4x256xf32>, vector<8x256xf32> -> vector<8x256xf32>
    %83 = arith.addf %77, %82 : vector<8x256xf32>
    %c8 = arith.constant 8 : index
    %c0_47 = arith.constant 0 : index
    %c0_48 = arith.constant 0 : index
    %84 = vector.load %arg3[%c8, %c0_47, %c0_48] : memref<9x8x4xf32, #tpu.memory_space<vmem>>, vector<1x8x4xf32>
    %85 = vector.shape_cast %84 : vector<1x8x4xf32> to vector<8x4xf32>
    %c0_49 = arith.constant 0 : index
    %c0_50 = arith.constant 0 : index
    %c34 = arith.constant 34 : index
    %86 = vector.load %arg2[%c0_49, %c0_50, %c34] : memref<1x4x290xf32, #tpu.memory_space<vmem>>, vector<1x4x256xf32>
    %87 = vector.shape_cast %86 : vector<1x4x256xf32> to vector<4x256xf32>
    %cst_51 = arith.constant dense<0.000000e+00> : vector<8x256xf32>
    %88 = tpu.matmul %85, %87, %cst_51 {dimension_numbers = #tpu.dot_dimension_numbers<[1], [0], [0], [1], [0, 0, 1, 1], [], []>} : vector<8x4xf32>, vector<4x256xf32>, vector<8x256xf32> -> vector<8x256xf32>
    %89 = vector.broadcast %24 : vector<1x256xf32> to vector<8x256xf32>
    %90 = arith.mulf %88, %89 : vector<8x256xf32>
    %91 = arith.addf %83, %90 : vector<8x256xf32>
    %c0_52 = arith.constant 0 : index
    %c0_53 = arith.constant 0 : index
    %92 = vector.load %arg4[%c0_52, %c0_53] : memref<8x1xf32, #tpu.memory_space<vmem>>, vector<8x1xf32>
    %93 = vector.broadcast %92 : vector<8x1xf32> to vector<8x256xf32>
    %94 = arith.addf %91, %93 : vector<8x256xf32>
    %c0_54 = arith.constant 0 : index
    %c0_55 = arith.constant 0 : index
    %95 = memref.load %arg1[%c0_54, %c0_55] : memref<1x1xf32, #tpu.memory_space<smem>>
    %cst_56 = arith.constant 0.000000e+00 : f32
    %96 = vector.broadcast %cst_56 : f32 to vector<8x256xf32>
    %97 = arith.cmpf oge, %94, %96 : vector<8x256xf32>
    %98 = vector.broadcast %95 : f32 to vector<8x256xf32>
    %99 = arith.mulf %98, %94 : vector<8x256xf32>
    %100 = arith.select %97, %94, %99 : vector<8x256xi1>, vector<8x256xf32>
    %cst_57 = arith.constant 0.000000e+00 : f32
    %101 = vector.broadcast %cst_57 : f32 to vector<8x17xf32>
    %c0_58 = arith.constant 0 : index
    %c0_59 = arith.constant 0 : index
    %102 = vector.load %arg8[%c0_58, %c0_59] : memref<8x290xf32, #tpu.memory_space<vmem>>, vector<8x17xf32>
    tpu.vector_store %arg8[%c0_58, %c0_59], %101 {strides = array<i32>} : memref<8x290xf32, #tpu.memory_space<vmem>>, vector<8x17xf32>,
    %cst_60 = arith.constant 0.000000e+00 : f32
    %103 = vector.broadcast %cst_60 : f32 to vector<8x17xf32>
    %c0_61 = arith.constant 0 : index
    %c273 = arith.constant 273 : index
    %104 = vector.load %arg8[%c0_61, %c273] : memref<8x290xf32, #tpu.memory_space<vmem>>, vector<8x17xf32>
    tpu.vector_store %arg8[%c0_61, %c273], %103 {strides = array<i32>} : memref<8x290xf32, #tpu.memory_space<vmem>>, vector<8x17xf32>,
    %c0_62 = arith.constant 0 : index
    %c17_63 = arith.constant 17 : index
    %105 = vector.load %arg8[%c0_62, %c17_63] : memref<8x290xf32, #tpu.memory_space<vmem>>, vector<8x256xf32>
    tpu.vector_store %arg8[%c0_62, %c17_63], %100 {strides = array<i32>} : memref<8x290xf32, #tpu.memory_space<vmem>>, vector<8x256xf32>,
    %cst_64 = arith.constant 0.000000e+00 : f32
    %106 = vector.broadcast %cst_64 : f32 to vector<4x256xf32>
    %c0_65 = arith.constant 0 : index
    %c0_66 = arith.constant 0 : index
    %c0_67 = arith.constant 0 : index
    %107 = vector.load %arg5[%c0_65, %c0_66, %c0_67] : memref<9x4x8xf32, #tpu.memory_space<vmem>>, vector<1x4x8xf32>
    %108 = vector.shape_cast %107 : vector<1x4x8xf32> to vector<4x8xf32>
    %c0_68 = arith.constant 0 : index
    %c0_69 = arith.constant 0 : index
    %109 = vector.load %arg8[%c0_68, %c0_69] : memref<8x290xf32, #tpu.memory_space<vmem>>, vector<8x256xf32>
    %cst_70 = arith.constant dense<0.000000e+00> : vector<4x256xf32>
    %110 = tpu.matmul %108, %109, %cst_70 {dimension_numbers = #tpu.dot_dimension_numbers<[1], [0], [0], [1], [0, 0, 1, 1], [], []>} : vector<4x8xf32>, vector<8x256xf32>, vector<4x256xf32> -> vector<4x256xf32>
    %111 = vector.broadcast %20 : vector<1x256xf32> to vector<4x256xf32>
    %112 = arith.mulf %110, %111 : vector<4x256xf32>
    %113 = arith.addf %106, %112 : vector<4x256xf32>
    %c1_71 = arith.constant 1 : index
    %c0_72 = arith.constant 0 : index
    %c0_73 = arith.constant 0 : index
    %114 = vector.load %arg5[%c1_71, %c0_72, %c0_73] : memref<9x4x8xf32, #tpu.memory_space<vmem>>, vector<1x4x8xf32>
    %115 = vector.shape_cast %114 : vector<1x4x8xf32> to vector<4x8xf32>
    %c0_74 = arith.constant 0 : index
    %c1_75 = arith.constant 1 : index
    %116 = vector.load %arg8[%c0_74, %c1_75] : memref<8x290xf32, #tpu.memory_space<vmem>>, vector<8x256xf32>
    %cst_76 = arith.constant dense<0.000000e+00> : vector<4x256xf32>
    %117 = tpu.matmul %115, %116, %cst_76 {dimension_numbers = #tpu.dot_dimension_numbers<[1], [0], [0], [1], [0, 0, 1, 1], [], []>} : vector<4x8xf32>, vector<8x256xf32>, vector<4x256xf32> -> vector<4x256xf32>
    %118 = arith.addf %113, %117 : vector<4x256xf32>
    %c2_77 = arith.constant 2 : index
    %c0_78 = arith.constant 0 : index
    %c0_79 = arith.constant 0 : index
    %119 = vector.load %arg5[%c2_77, %c0_78, %c0_79] : memref<9x4x8xf32, #tpu.memory_space<vmem>>, vector<1x4x8xf32>
    %120 = vector.shape_cast %119 : vector<1x4x8xf32> to vector<4x8xf32>
    %c0_80 = arith.constant 0 : index
    %c2_81 = arith.constant 2 : index
    %121 = vector.load %arg8[%c0_80, %c2_81] : memref<8x290xf32, #tpu.memory_space<vmem>>, vector<8x256xf32>
    %cst_82 = arith.constant dense<0.000000e+00> : vector<4x256xf32>
    %122 = tpu.matmul %120, %121, %cst_82 {dimension_numbers = #tpu.dot_dimension_numbers<[1], [0], [0], [1], [0, 0, 1, 1], [], []>} : vector<4x8xf32>, vector<8x256xf32>, vector<4x256xf32> -> vector<4x256xf32>
    %123 = vector.broadcast %24 : vector<1x256xf32> to vector<4x256xf32>
    %124 = arith.mulf %122, %123 : vector<4x256xf32>
    %125 = arith.addf %118, %124 : vector<4x256xf32>
    %c3_83 = arith.constant 3 : index
    %c0_84 = arith.constant 0 : index
    %c0_85 = arith.constant 0 : index
    %126 = vector.load %arg5[%c3_83, %c0_84, %c0_85] : memref<9x4x8xf32, #tpu.memory_space<vmem>>, vector<1x4x8xf32>
    %127 = vector.shape_cast %126 : vector<1x4x8xf32> to vector<4x8xf32>
    %c0_86 = arith.constant 0 : index
    %c16_87 = arith.constant 16 : index
    %128 = vector.load %arg8[%c0_86, %c16_87] : memref<8x290xf32, #tpu.memory_space<vmem>>, vector<8x256xf32>
    %cst_88 = arith.constant dense<0.000000e+00> : vector<4x256xf32>
    %129 = tpu.matmul %127, %128, %cst_88 {dimension_numbers = #tpu.dot_dimension_numbers<[1], [0], [0], [1], [0, 0, 1, 1], [], []>} : vector<4x8xf32>, vector<8x256xf32>, vector<4x256xf32> -> vector<4x256xf32>
    %130 = vector.broadcast %20 : vector<1x256xf32> to vector<4x256xf32>
    %131 = arith.mulf %129, %130 : vector<4x256xf32>
    %132 = arith.addf %125, %131 : vector<4x256xf32>
    %c4_89 = arith.constant 4 : index
    %c0_90 = arith.constant 0 : index
    %c0_91 = arith.constant 0 : index
    %133 = vector.load %arg5[%c4_89, %c0_90, %c0_91] : memref<9x4x8xf32, #tpu.memory_space<vmem>>, vector<1x4x8xf32>
    %134 = vector.shape_cast %133 : vector<1x4x8xf32> to vector<4x8xf32>
    %c0_92 = arith.constant 0 : index
    %c17_93 = arith.constant 17 : index
    %135 = vector.load %arg8[%c0_92, %c17_93] : memref<8x290xf32, #tpu.memory_space<vmem>>, vector<8x256xf32>
    %cst_94 = arith.constant dense<0.000000e+00> : vector<4x256xf32>
    %136 = tpu.matmul %134, %135, %cst_94 {dimension_numbers = #tpu.dot_dimension_numbers<[1], [0], [0], [1], [0, 0, 1, 1], [], []>} : vector<4x8xf32>, vector<8x256xf32>, vector<4x256xf32> -> vector<4x256xf32>
    %137 = arith.addf %132, %136 : vector<4x256xf32>
    %c5_95 = arith.constant 5 : index
    %c0_96 = arith.constant 0 : index
    %c0_97 = arith.constant 0 : index
    %138 = vector.load %arg5[%c5_95, %c0_96, %c0_97] : memref<9x4x8xf32, #tpu.memory_space<vmem>>, vector<1x4x8xf32>
    %139 = vector.shape_cast %138 : vector<1x4x8xf32> to vector<4x8xf32>
    %c0_98 = arith.constant 0 : index
    %c18_99 = arith.constant 18 : index
    %140 = vector.load %arg8[%c0_98, %c18_99] : memref<8x290xf32, #tpu.memory_space<vmem>>, vector<8x256xf32>
    %cst_100 = arith.constant dense<0.000000e+00> : vector<4x256xf32>
    %141 = tpu.matmul %139, %140, %cst_100 {dimension_numbers = #tpu.dot_dimension_numbers<[1], [0], [0], [1], [0, 0, 1, 1], [], []>} : vector<4x8xf32>, vector<8x256xf32>, vector<4x256xf32> -> vector<4x256xf32>
    %142 = vector.broadcast %24 : vector<1x256xf32> to vector<4x256xf32>
    %143 = arith.mulf %141, %142 : vector<4x256xf32>
    %144 = arith.addf %137, %143 : vector<4x256xf32>
    %c6_101 = arith.constant 6 : index
    %c0_102 = arith.constant 0 : index
    %c0_103 = arith.constant 0 : index
    %145 = vector.load %arg5[%c6_101, %c0_102, %c0_103] : memref<9x4x8xf32, #tpu.memory_space<vmem>>, vector<1x4x8xf32>
    %146 = vector.shape_cast %145 : vector<1x4x8xf32> to vector<4x8xf32>
    %c0_104 = arith.constant 0 : index
    %c32_105 = arith.constant 32 : index
    %147 = vector.load %arg8[%c0_104, %c32_105] : memref<8x290xf32, #tpu.memory_space<vmem>>, vector<8x256xf32>
    %cst_106 = arith.constant dense<0.000000e+00> : vector<4x256xf32>
    %148 = tpu.matmul %146, %147, %cst_106 {dimension_numbers = #tpu.dot_dimension_numbers<[1], [0], [0], [1], [0, 0, 1, 1], [], []>} : vector<4x8xf32>, vector<8x256xf32>, vector<4x256xf32> -> vector<4x256xf32>
    %149 = vector.broadcast %20 : vector<1x256xf32> to vector<4x256xf32>
    %150 = arith.mulf %148, %149 : vector<4x256xf32>
    %151 = arith.addf %144, %150 : vector<4x256xf32>
    %c7_107 = arith.constant 7 : index
    %c0_108 = arith.constant 0 : index
    %c0_109 = arith.constant 0 : index
    %152 = vector.load %arg5[%c7_107, %c0_108, %c0_109] : memref<9x4x8xf32, #tpu.memory_space<vmem>>, vector<1x4x8xf32>
    %153 = vector.shape_cast %152 : vector<1x4x8xf32> to vector<4x8xf32>
    %c0_110 = arith.constant 0 : index
    %c33_111 = arith.constant 33 : index
    %154 = vector.load %arg8[%c0_110, %c33_111] : memref<8x290xf32, #tpu.memory_space<vmem>>, vector<8x256xf32>
    %cst_112 = arith.constant dense<0.000000e+00> : vector<4x256xf32>
    %155 = tpu.matmul %153, %154, %cst_112 {dimension_numbers = #tpu.dot_dimension_numbers<[1], [0], [0], [1], [0, 0, 1, 1], [], []>} : vector<4x8xf32>, vector<8x256xf32>, vector<4x256xf32> -> vector<4x256xf32>
    %156 = arith.addf %151, %155 : vector<4x256xf32>
    %c8_113 = arith.constant 8 : index
    %c0_114 = arith.constant 0 : index
    %c0_115 = arith.constant 0 : index
    %157 = vector.load %arg5[%c8_113, %c0_114, %c0_115] : memref<9x4x8xf32, #tpu.memory_space<vmem>>, vector<1x4x8xf32>
    %158 = vector.shape_cast %157 : vector<1x4x8xf32> to vector<4x8xf32>
    %c0_116 = arith.constant 0 : index
    %c34_117 = arith.constant 34 : index
    %159 = vector.load %arg8[%c0_116, %c34_117] : memref<8x290xf32, #tpu.memory_space<vmem>>, vector<8x256xf32>
    %cst_118 = arith.constant dense<0.000000e+00> : vector<4x256xf32>
    %160 = tpu.matmul %158, %159, %cst_118 {dimension_numbers = #tpu.dot_dimension_numbers<[1], [0], [0], [1], [0, 0, 1, 1], [], []>} : vector<4x8xf32>, vector<8x256xf32>, vector<4x256xf32> -> vector<4x256xf32>
    %161 = vector.broadcast %24 : vector<1x256xf32> to vector<4x256xf32>
    %162 = arith.mulf %160, %161 : vector<4x256xf32>
    %163 = arith.addf %156, %162 : vector<4x256xf32>
    %c0_119 = arith.constant 0 : index
    %c0_120 = arith.constant 0 : index
    %164 = vector.load %arg6[%c0_119, %c0_120] : memref<4x1xf32, #tpu.memory_space<vmem>>, vector<4x1xf32>
    %165 = vector.broadcast %164 : vector<4x1xf32> to vector<4x256xf32>
    %166 = arith.addf %163, %165 : vector<4x256xf32>
    %c0_121 = arith.constant 0 : index
    %c0_122 = arith.constant 0 : index
    %c17_123 = arith.constant 17 : index
    %167 = vector.load %arg2[%c0_121, %c0_122, %c17_123] : memref<1x4x290xf32, #tpu.memory_space<vmem>>, vector<1x4x256xf32>
    %168 = vector.shape_cast %167 : vector<1x4x256xf32> to vector<4x256xf32>
    %169 = arith.addf %166, %168 : vector<4x256xf32>
    %c0_124 = arith.constant 0 : index
    %c0_125 = arith.constant 0 : index
    %c0_126 = arith.constant 0 : index
    %170 = vector.load %arg7[%c0_124, %c0_125, %c0_126] : memref<1x4x256xf32, #tpu.memory_space<vmem>>, vector<1x4x256xf32>
    %171 = vector.shape_cast %170 : vector<1x4x256xf32> to vector<4x256xf32>
    %172 = vector.shape_cast %169 : vector<4x256xf32> to vector<1x4x256xf32>
    tpu.vector_store %arg7[%c0_124, %c0_125, %c0_126], %172 {strides = array<i32>} : memref<1x4x256xf32, #tpu.memory_space<vmem>>, vector<1x4x256xf32>,
    return
  }
  func.func @transform_0(%arg0: i32) -> (i32, i32) {
    %c0_i32 = arith.constant 0 : i32
    %c0_i32_0 = arith.constant 0 : i32
    %c0_i32_1 = arith.constant 0 : i32
    return %c0_i32, %c0_i32_0 : i32, i32
  }
  func.func @transform_1(%arg0: i32) -> (i32, i32, i32) {
    %c0_i32 = arith.constant 0 : i32
    %c0_i32_0 = arith.constant 0 : i32
    %c0_i32_1 = arith.constant 0 : i32
    return %arg0, %c0_i32, %c0_i32_0 : i32, i32, i32
  }
  func.func @transform_2(%arg0: i32) -> (i32, i32, i32) {
    %c0_i32 = arith.constant 0 : i32
    %c0_i32_0 = arith.constant 0 : i32
    %c0_i32_1 = arith.constant 0 : i32
    %c0_i32_2 = arith.constant 0 : i32
    return %c0_i32, %c0_i32_0, %c0_i32_1 : i32, i32, i32
  }
  func.func @transform_3(%arg0: i32) -> (i32, i32) {
    %c0_i32 = arith.constant 0 : i32
    %c0_i32_0 = arith.constant 0 : i32
    %c0_i32_1 = arith.constant 0 : i32
    return %c0_i32, %c0_i32_0 : i32, i32
  }
  func.func @transform_4(%arg0: i32) -> (i32, i32, i32) {
    %c0_i32 = arith.constant 0 : i32
    %c0_i32_0 = arith.constant 0 : i32
    %c0_i32_1 = arith.constant 0 : i32
    %c0_i32_2 = arith.constant 0 : i32
    return %c0_i32, %c0_i32_0, %c0_i32_1 : i32, i32, i32
  }
  func.func @transform_5(%arg0: i32) -> (i32, i32) {
    %c0_i32 = arith.constant 0 : i32
    %c0_i32_0 = arith.constant 0 : i32
    %c0_i32_1 = arith.constant 0 : i32
    return %c0_i32, %c0_i32_0 : i32, i32
  }
  func.func @transform_6(%arg0: i32) -> (i32, i32, i32) {
    %c0_i32 = arith.constant 0 : i32
    %c0_i32_0 = arith.constant 0 : i32
    %c0_i32_1 = arith.constant 0 : i32
    return %arg0, %c0_i32, %c0_i32_0 : i32, i32, i32
  }
}

</mosaic_0001>

<bundles_post_ra>
// kernel: basic_forward.1
= control target key start
LH: loop header
LB: loop body
LE: loop exit
PB: predicated region body
PF: predicated region fallthrough
CT: control target
= control target key end

     0   :  { %s1773_s23 = smov 0   ;;  %s2051_s0 = inlined_call_operand.<no memory space> [shape: f32[1,1], index: 0, kind: input, shape index: {}]   ;;  %s2052_s1 = inlined_call_operand.vmem [shape: f32[2,4,290], index: 1, kind: input, shape index: {}]   ;;  %s2053_s2 = inlined_call_operand.vmem [shape: f32[9,8,4], index: 2, kind: input, shape index: {}]   ;;  %s2054_s3 = inlined_call_operand.vmem [shape: f32[8,1], index: 3, kind: input, shape index: {}]   ;;  %s2055_s4 = inlined_call_operand.vmem [shape: f32[9,4,8], index: 4, kind: input, shape index: {}]   ;;  %s2056_s5 = inlined_call_operand.vmem [shape: f32[4,1], index: 5, kind: input, shape index: {}]   ;;  %s2057_s6 = inlined_call_operand.vmem [shape: f32[2,4,256], index: 6, kind: output, shape index: {}]  }
   0x1   :  { %11 = sst [smem:[#allocation3]] %s2051_s0 }
   0x2 LB: > { %s1569_s24 = sadd.s32 4294967295, %s1722_s23   ;;  %p1573_p0 = scmp.ge.s32.totalorder %s1722_s23, 1  ;;  %s1722_s23 = sphi %s1773_s23, %s17_s23  }
   0x3   : > { %p213_p1 = scmp.lt.s32.totalorder %s1722_s23, 3 }
   0x5   : > { %p214_p2 = pnand %p1573_p0, %p213_p1 }
   0x6   : > { %p243_p3 = scmp.lt.s32.totalorder (!%p214_p2), %s1569_s24, 1  ;;  %s1724_s28 = smov (!%p214_p2), 127  }
   0x7   : > { %217 = sbr.rel (%p214_p2) target bundleno = 764 (0x2fc), region = 44  ;;  %s1725_s29 = smov (!%p214_p2), 126  }
   0x8   : > { %s1726_s30 = smov (!%p214_p2), 112   ;;  %s1727_s7 = smov (!%p214_p2), 111  }
   0x9   : > { %s1728_s8 = smov (!%p214_p2), 110   ;;  %s1729_s9 = smov (!%p214_p2), 96  }
   0xa   : > { %s1730_s10 = smov (!%p214_p2), 95   ;;  %s1731_s11 = smov (!%p214_p2), 94  }
   0xb   : > { %s929_s17 = sld [smem:[#allocation3]] (!%p214_p2)  ;;  %s1734_s18 = smov (!%p214_p2), 17  }
   0xc   : > { %s2059_s24 = smov (!%p243_p3, %s1569_s24), 1  ;;  %vm302_vm0 = vcmask 1043456   ;;  %vm298_vm1 = vcmask 31744   ;;  %v292_v37 = vld [vmem:[%s2053_s2] sm:$0xff]  ;;  %vm439_vm2 = vcmask 1031168   ;;  %v1590_v40 = vld [vmem:[%s2053_s2 + $0x10] sm:$0xff] }
   0xd   : > { %s1654_s0 = smul.u32 12, %s2059_s24  ;;  %vm369_vm3 = vcmask 1039360   ;;  %v1585_v46 = vld [vmem:[%s2053_s2 + $0x8] sm:$0xff]  ;;  %vm511_vm4 = vcmask 916480   ;;  %v1595_v53 = vld [vmem:[%s2053_s2 + $0x18] sm:$0xff]  ;;  %vm583_vm5 = vcmask 908288  }
   0xe   : > { %v1600_v59 = vld [vmem:[%s2053_s2 + $0x20] sm:$0xff]  ;;  %v1732_v63 = vmov 0   ;;  %vm653_vm6 = vcmask 900096   ;;  %vm725_vm7 = vcmask 785408   ;;  %vm797_vm8 = vcmask 777216   ;;  %s1653_s16 = sshll.u32 %s2059_s24, 3 }
   0xf   : > { %s1787_s27 = scalar_lea.vmem %s2052_s1, %s1654_s0  ;;  %v921_v62 = vld [vmem:[%s2054_s3] sm:$0xff]  ;;  %1674 = vset.pattern.permute.xlu0 %v1732_v63  ;;  %1715 = vset.pattern.permute.xlu2 %v1732_v63  ;;  %vm867_vm9 = vcmask 769024   ;;  %vm939_vm14 = vcmask 277640   ;;  %vm937_vm15 = vcmask 138240  }
  0x10   : > { %v354_v0 = vld [vmem:[%s1787_s27 + $0x8] sm:$0xf]  ;;  %v1791_v1 = vld [vmem:[%s1787_s27] sm:$0xff] }
  0x11   : > { %359 = vst [vmem:[#allocation1 + $0x10] ss:$2 sm:$0xff] %v354_v0  ;;  %v424_v2 = vld [vmem:[%s1787_s27 + $0x8] sm:$0xf] }
  0x12   : > { %295 = vst [vmem:[#allocation1] ss:$2 sm:$0xff] %v1791_v1  ;;  %v496_v9 = vld [vmem:[%s1787_s27 + $0x8] sm:$0xf] }
  0x13   : > { %v568_v10 = vld [vmem:[%s1787_s27 + $0x8] sm:$0xf] }
  0x14   : > { %v638_v14 = vld [vmem:[%s1787_s27 + $0x8] sm:$0xf] }
  0x15   : > { %v710_v18 = vld [vmem:[%s1787_s27 + $0x8] sm:$0xf] }
  0x16   : > { %v782_v22 = vld [vmem:[%s1787_s27 + $0x8] sm:$0xf] }
  0x17   : > { %v852_v26 = vld [vmem:[%s1787_s27 + $0x8] sm:$0xf] }
  0x18   : > { %v362_v3 = vld.sshfl [vmem:[#allocation1 + $0x10] sm:$0xff pattern:$0x75316420]  ;;  %v1487_v30 = vld [vmem:[%s1787_s27 + $0x8] sm:$0xf] }
  0x19   : > { %367 = vrot.lane.b32.xlu1 %v362_v3, %s1724_s28  ;;  %429 = vst [vmem:[#allocation1 + $0x10] ss:$2 sm:$0xff] %v424_v2  ;;  %v1796_v4 = vld.sshfl [vmem:[#allocation1] sm:$0xff pattern:$0x75316420]  ;;  %v1605_v2 = vld [vmem:[%s2053_s2 + $0x28] sm:$0xff] }
  0x1a   : > { %v1798_v5 = vld.sshfl [vmem:[#allocation1 + $0x8] sm:$0xff pattern:$0x75316420]  ;;  %1581 = vmatpush.msk.msra.mxu0 %vm302_vm0, %v1796_v4 }
  0x1b   : > { %357 = vst [vmem:[#allocation1] ss:$2 sm:$0xff] %v1791_v1  ;;  %1583 = vmatpush.msk.msra.mxu1 %vm302_vm0, %v1798_v5  ;;  %1582 = vmatmul.msk.f32.vlgmr.msra.gmra.mxu0 %vm298_vm1, %v292_v37 }
  0x1c   : > { %1584 = vmatmul.msk.f32.vlgmr.msra.gmra.mxu1 %vm298_vm1, %v292_v37 }
  0x20   : > { %v432_v6 = vld.sshfl [vmem:[#allocation1 + $0x10] sm:$0xff pattern:$0x75316420] }
  0x21   : > { %437 = vrot.lane.b32.xlu2 %v432_v6, %s1725_s29  ;;  %501 = vst [vmem:[#allocation1 + $0x10] ss:$2 sm:$0xff] %v496_v9 }
  0x22   : > { %v360_v7 = vld.sshfl [vmem:[#allocation1] sm:$0xff pattern:$0x75316420]  ;;  %v361_v8 = vld.sshfl [vmem:[#allocation1 + $0x8] sm:$0xff pattern:$0x75316420] }
  0x23   : > { %363 = vrot.lane.b32.xlu0 %v360_v7, %s1724_s28  ;;  %427 = vst [vmem:[#allocation1] ss:$2 sm:$0xff] %v1791_v1 }
  0x28   : > { %v504_v13 = vld.sshfl [vmem:[#allocation1 + $0x10] sm:$0xff pattern:$0x75316420] }
  0x29   : > { %573 = vst [vmem:[#allocation1 + $0x10] ss:$2 sm:$0xff] %v568_v10 }
  0x2a   : > { %v430_v11 = vld.sshfl [vmem:[#allocation1] sm:$0xff pattern:$0x75316420]  ;;  %v431_v12 = vld.sshfl [vmem:[#allocation1 + $0x8] sm:$0xff pattern:$0x75316420] }
  0x2b   : > { %365 = vrot.lane.b32.xlu0 %v361_v8, %s1724_s28  ;;  %433 = vrot.lane.b32.xlu1 %v430_v11, %s1725_s29  ;;  %499 = vst [vmem:[#allocation1] ss:$2 sm:$0xff] %v1791_v1  ;;  %v1610_v8 = vld [vmem:[%s2053_s2 + $0x30] sm:$0xff] }
  0x2c   : > { %435 = vrot.lane.b32.xlu2 %v431_v12, %s1725_s29 }
  0x30   : > { %v576_v17 = vld.sshfl [vmem:[#allocation1 + $0x10] sm:$0xff pattern:$0x75316420] }
  0x31   : > { %643 = vst [vmem:[#allocation1 + $0x10] ss:$2 sm:$0xff] %v638_v14  ;;  %v1615_v14 = vld [vmem:[%s2053_s2 + $0x38] sm:$0xff] }
  0x32   : > { %v503_v15 = vld.sshfl [vmem:[#allocation1 + $0x8] sm:$0xff pattern:$0x75316420]  ;;  %v502_v16 = vld.sshfl [vmem:[#allocation1] sm:$0xff pattern:$0x75316420] }
  0x33   : > { %507 = vrot.lane.b32.xlu1 %v503_v15, %s1726_s30  ;;  %505 = vrot.lane.b32.xlu0 %v502_v16, %s1726_s30  ;;  %571 = vst [vmem:[#allocation1] ss:$2 sm:$0xff] %v1791_v1 }
  0x34   : > { %509 = vrot.lane.b32.xlu2 %v504_v13, %s1726_s30 }
  0x38   : > { %v646_v21 = vld.sshfl [vmem:[#allocation1 + $0x10] sm:$0xff pattern:$0x75316420] }
  0x39   : > { %715 = vst [vmem:[#allocation1 + $0x10] ss:$2 sm:$0xff] %v710_v18 }
  0x3a   : > { %v575_v19 = vld.sshfl [vmem:[#allocation1 + $0x8] sm:$0xff pattern:$0x75316420]  ;;  %v574_v20 = vld.sshfl [vmem:[#allocation1] sm:$0xff pattern:$0x75316420] }
  0x3b   : > { %579 = vrot.lane.b32.xlu1 %v575_v19, %s1727_s7  ;;  %577 = vrot.lane.b32.xlu0 %v574_v20, %s1727_s7  ;;  %641 = vst [vmem:[#allocation1] ss:$2 sm:$0xff] %v1791_v1  ;;  %v1620_v20 = vld [vmem:[%s2053_s2 + $0x40] sm:$0xff] }
  0x3c   : > { %581 = vrot.lane.b32.xlu2 %v576_v17, %s1727_s7 }
  0x40   : > { %v718_v25 = vld.sshfl [vmem:[#allocation1 + $0x10] sm:$0xff pattern:$0x75316420] }
  0x41   : > { %787 = vst [vmem:[#allocation1 + $0x10] ss:$2 sm:$0xff] %v782_v22 }
  0x42   : > { %v645_v23 = vld.sshfl [vmem:[#allocation1 + $0x8] sm:$0xff pattern:$0x75316420]  ;;  %v644_v24 = vld.sshfl [vmem:[#allocation1] sm:$0xff pattern:$0x75316420] }
  0x43   : > { %649 = vrot.lane.b32.xlu1 %v645_v23, %s1728_s8  ;;  %647 = vrot.lane.b32.xlu0 %v644_v24, %s1728_s8  ;;  %713 = vst [vmem:[#allocation1] ss:$2 sm:$0xff] %v1791_v1  ;;  %v253_v23 = vlaneseq }
  0x44   : > { %651 = vrot.lane.b32.xlu2 %v646_v21, %s1728_s8 }
  0x45   : > { %v254_v24 = vand.u32 127, %v253_v23 }
  0x48   : > { %v790_v29 = vld.sshfl [vmem:[#allocation1 + $0x10] sm:$0xff pattern:$0x75316420] }
  0x49   : > { %857 = vst [vmem:[#allocation1 + $0x10] ss:$2 sm:$0xff] %v852_v26 }
  0x4a   : > { %v717_v27 = vld.sshfl [vmem:[#allocation1 + $0x8] sm:$0xff pattern:$0x75316420]  ;;  %v716_v28 = vld.sshfl [vmem:[#allocation1] sm:$0xff pattern:$0x75316420] }
  0x4b   : > { %721 = vrot.lane.b32.xlu1 %v717_v27, %s1729_s9  ;;  %719 = vrot.lane.b32.xlu0 %v716_v28, %s1729_s9  ;;  %785 = vst [vmem:[#allocation1] ss:$2 sm:$0xff] %v1791_v1 }
  0x4c   : > { %723 = vrot.lane.b32.xlu2 %v718_v25, %s1729_s9  ;;  %v255_v25 = vadd.s32 128, %v254_v24 }
  0x4e   : > { %v267_v27 = vand.u32 15, %v255_v25 }
  0x50   : > { %v860_v33 = vld.sshfl [vmem:[#allocation1 + $0x10] sm:$0xff pattern:$0x75316420]  ;;  %vm281_vm10 = vcmp.gt.s32.totalorder %v267_v27, 0  ;;  %vm287_vm11 = vcmp.lt.s32.totalorder %v267_v27, 15 }
  0x51   : > { %1492 = vst [vmem:[#allocation1 + $0x10] ss:$2 sm:$0xff] %v1487_v30  ;;  %v260_v30 = vand.u32 15, %v254_v24 }
  0x52   : > { %v789_v31 = vld.sshfl [vmem:[#allocation1 + $0x8] sm:$0xff pattern:$0x75316420]  ;;  %v788_v32 = vld.sshfl [vmem:[#allocation1] sm:$0xff pattern:$0x75316420] }
  0x53   : > { %793 = vrot.lane.b32.xlu1 %v789_v31, %s1730_s10  ;;  %791 = vrot.lane.b32.xlu0 %v788_v32, %s1730_s10  ;;  %855 = vst [vmem:[#allocation1] ss:$2 sm:$0xff] %v1791_v1  ;;  %v1733_v31 = vmov 0.0   ;;  %vm280_vm12 = vcmp.gt.s32.totalorder %v260_v30, 0  ;;  %vm286_vm13 = vcmp.lt.s32.totalorder %v260_v30, 15 }
  0x54   : > { %795 = vrot.lane.b32.xlu2 %v790_v29, %s1730_s10  ;;  %v1923_v32 = vsel %vm281_vm10, 1.0, %v1733_v31  ;;  %v1926_v37 = vsel %vm287_vm11, 1.0, %v1733_v31  ;;  %940 = vst.msk [vmem:[#allocation2 + $0x10] sm:$0xff] %vm939_vm14, %v1733_v31  ;;  %vm951_vm11 = vcmask 1047688  }
  0x55   : > { %938 = vst.msk [vmem:[#allocation2] sm:$0xff] %vm937_vm15, %v1733_v31 }
  0x5a   : > { %v859_v34 = vld.sshfl [vmem:[#allocation1 + $0x8] sm:$0xff pattern:$0x75316420]  ;;  %v858_v35 = vld.sshfl [vmem:[#allocation1] sm:$0xff pattern:$0x75316420] }
  0x5b   : > { %863 = vrot.lane.b32.xlu1 %v859_v34, %s1731_s11  ;;  %861 = vrot.lane.b32.xlu0 %v858_v35, %s1731_s11  ;;  %1490 = vst [vmem:[#allocation1] ss:$2 sm:$0xff] %v1791_v1 }
  0x5c   : > { %865 = vrot.lane.b32.xlu2 %v860_v33, %s1731_s11 }
  0x63   : > { %924 = vperm.xlu0 %1674, %v921_v62  }
  0x7b   : > { %v438_v36 = vpop.permute.xlu2 %437 }
  0x86   : > { %v436_v38 = vpop.permute.xlu2 %435 }
  0x87   : > { %v441_v39 = vsel %vm439_vm2, %v436_v38, %v438_v36 }
  0x88   : > { %1593 = vmatpush.msk.msrb.mxu1 %vm302_vm0, %v441_v39 }
  0x89   : > { %1594 = vmatmul.msk.f32.vlgmr.msrb.gmra.mxu1 %vm298_vm1, %v1590_v40 }
  0x8b   : > { %v368_v41 = vpop.permute.xlu1 %367 }
  0x8e   : > { %v510_v43 = vpop.permute.xlu2 %509 }
  0x95   : > { %v364_v42 = vpop.permute.xlu0 %363 }
  0x96   : > { %v582_v50 = vpop.permute.xlu2 %581 }
  0x98   : > { %v324_v28 = vpop.f32.mrf.mxu0 }
  0x99   : > { %v344_v26 = vpop.f32.mrf.mxu1 }
  0x9a   : > { %v348_v35 = vmul.f32 %v1923_v32, %v344_v26 }
  0x9d   : > { %v366_v44 = vpop.permute.xlu0 %365  ;;  %v434_v45 = vpop.permute.xlu1 %433 }
  0x9e   : > { %v370_v47 = vsel %vm369_vm3, %v364_v42, %v366_v44  ;;  %v371_v48 = vsel %vm369_vm3, %v366_v44, %v368_v41  ;;  %v440_v49 = vsel %vm439_vm2, %v434_v45, %v436_v38  ;;  %v652_v56 = vpop.permute.xlu2 %651  ;;  %v1928_v38 = vsel %vm280_vm12, 1.0, %v1733_v31 }
  0x9f   : > { %1586 = vmatpush.msk.msra.mxu2 %vm302_vm0, %v370_v47  ;;  %1588 = vmatpush.msk.msra.mxu3 %vm302_vm0, %v371_v48  ;;  %v347_v42 = vmul.f32 %v1928_v38, %v324_v28  ;;  %vm958_vm12 = vcmask 64512  }
  0xa0   : > { %1591 = vmatpush.msk.msrb.mxu0 %vm302_vm0, %v440_v49  ;;  %1587 = vmatmul.msk.f32.vlgmr.msra.gmra.mxu2 %vm298_vm1, %v1585_v46 }
  0xa1   : > { %1592 = vmatmul.msk.f32.vlgmr.msrb.gmra.mxu0 %vm298_vm1, %v1590_v40  ;;  %1589 = vmatmul.msk.f32.vlgmr.msra.gmra.mxu3 %vm298_vm1, %v1585_v46 }
  0xa5   : > { %v508_v51 = vpop.permute.xlu1 %507  ;;  %v506_v52 = vpop.permute.xlu0 %505 }
  0xa6   : > { %v512_v54 = vsel %vm511_vm4, %v506_v52, %v508_v51  ;;  %v513_v55 = vsel %vm511_vm4, %v508_v51, %v510_v43  ;;  %v724_v5 = vpop.permute.xlu2 %723  ;;  %v1932_v43 = vsel %vm286_vm13, 1.0, %v1733_v31 }
  0xa7   : > { %1596 = vmatpush.msk.msrb.mxu2 %vm302_vm0, %v512_v54  ;;  %1598 = vmatpush.msk.msrb.mxu3 %vm302_vm0, %v513_v55 }
  0xa8   : > { %1597 = vmatmul.msk.f32.vlgmr.msrb.gmra.mxu2 %vm298_vm1, %v1595_v53 }
  0xa9   : > { %1599 = vmatmul.msk.f32.vlgmr.msrb.gmra.mxu3 %vm298_vm1, %v1595_v53 }
  0xad   : > { %v580_v57 = vpop.permute.xlu1 %579  ;;  %v578_v58 = vpop.permute.xlu0 %577 }
  0xae   : > { %v585_v60 = vsel %vm583_vm5, %v580_v57, %v582_v50  ;;  %v584_v61 = vsel %vm583_vm5, %v578_v58, %v580_v57  ;;  %v796_v11 = vpop.permute.xlu2 %795 }
  0xaf   : > { %1601 = vmatpush.msk.msra.mxu0 %vm302_vm0, %v584_v61  ;;  %1603 = vmatpush.msk.msra.mxu1 %vm302_vm0, %v585_v60 }
  0xb0   : > { %1602 = vmatmul.msk.f32.vlgmr.msra.gmra.mxu0 %vm298_vm1, %v1600_v59  ;;  %1604 = vmatmul.msk.f32.vlgmr.msra.gmra.mxu1 %vm298_vm1, %v1600_v59 }
  0xb5   : > { %v650_v0 = vpop.permute.xlu1 %649  ;;  %v648_v1 = vpop.permute.xlu0 %647 }
  0xb6   : > { %v655_v3 = vsel %vm653_vm6, %v650_v0, %v652_v56  ;;  %v654_v4 = vsel %vm653_vm6, %v648_v1, %v650_v0  ;;  %v866_v17 = vpop.permute.xlu2 %865 }
  0xb7   : > { %1606 = vmatpush.msk.msra.mxu2 %vm302_vm0, %v654_v4  ;;  %1608 = vmatpush.msk.msra.mxu3 %vm302_vm0, %v655_v3 }
  0xb8   : > { %1607 = vmatmul.msk.f32.vlgmr.msra.gmra.mxu2 %vm298_vm1, %v1605_v2  ;;  %1609 = vmatmul.msk.f32.vlgmr.msra.gmra.mxu3 %vm298_vm1, %v1605_v2 }
  0xbd   : > { %v722_v6 = vpop.permute.xlu1 %721  ;;  %v720_v7 = vpop.permute.xlu0 %719 }
  0xbe   : > { %v727_v9 = vsel %vm725_vm7, %v722_v6, %v724_v5  ;;  %v726_v10 = vsel %vm725_vm7, %v720_v7, %v722_v6 }
  0xbf   : > { %1611 = vmatpush.msk.msrb.mxu0 %vm302_vm0, %v726_v10  ;;  %1613 = vmatpush.msk.msrb.mxu1 %vm302_vm0, %v727_v9 }
  0xc0   : > { %1612 = vmatmul.msk.f32.vlgmr.msrb.gmra.mxu0 %vm298_vm1, %v1610_v8  ;;  %1614 = vmatmul.msk.f32.vlgmr.msrb.gmra.mxu1 %vm298_vm1, %v1610_v8 }
  0xc5   : > { %v794_v12 = vpop.permute.xlu1 %793  ;;  %v792_v13 = vpop.permute.xlu0 %791 }
  0xc6   : > { %v799_v15 = vsel %vm797_vm8, %v794_v12, %v796_v11  ;;  %v798_v16 = vsel %vm797_vm8, %v792_v13, %v794_v12 }
  0xc7   : > { %1616 = vmatpush.msk.msrb.mxu2 %vm302_vm0, %v798_v16  ;;  %1618 = vmatpush.msk.msrb.mxu3 %vm302_vm0, %v799_v15  ;;  %v932_v16 = vstv %s929_s17 }
  0xc8   : > { %1617 = vmatmul.msk.f32.vlgmr.msrb.gmra.mxu2 %vm298_vm1, %v1615_v14  ;;  %1619 = vmatmul.msk.f32.vlgmr.msrb.gmra.mxu3 %vm298_vm1, %v1615_v14 }
  0xcd   : > { %v864_v18 = vpop.permute.xlu1 %863  ;;  %v862_v19 = vpop.permute.xlu0 %861 }
  0xce   : > { %v869_v21 = vsel %vm867_vm9, %v864_v18, %v866_v17  ;;  %v868_v22 = vsel %vm867_vm9, %v862_v19, %v864_v18 }
  0xcf   : > { %1621 = vmatpush.msk.msra.mxu0 %vm302_vm0, %v868_v22  ;;  %1623 = vmatpush.msk.msra.mxu1 %vm302_vm0, %v869_v21 }
  0xd0   : > { %1622 = vmatmul.msk.f32.vlgmr.msra.gmra.mxu0 %vm298_vm1, %v1620_v20  ;;  %1624 = vmatmul.msk.f32.vlgmr.msra.gmra.mxu1 %vm298_vm1, %v1620_v20 }
  0xd5   : > { %v925_v13 = vpop.permute.xlu0 %924 }
 0x106   : > { %v486_v34 = vpop.f32.mrf.mxu1 }
 0x107   : > { %v490_v40 = vmul.f32 %v1926_v37, %v486_v34 }
 0x11e   : > { %v466_v36 = vpop.f32.mrf.mxu0 }
 0x11f   : > { %v489_v49 = vmul.f32 %v1932_v43, %v466_v36 }
 0x123   : > { %v396_v33 = vpop.f32.mrf.mxu2 }
 0x124   : > { %v416_v29 = vpop.f32.mrf.mxu3  ;;  %v419_v48 = vadd.f32 %v396_v33, %v347_v42 }
 0x125   : > { %v420_v39 = vadd.f32 %v416_v29, %v348_v35  ;;  %v955_v29 = vld [vmem:[%s2055_s4] sm:$0xf] }
 0x126   : > { %v491_v52 = vadd.f32 %v489_v49, %v419_v48 }
 0x127   : > { %v492_v44 = vadd.f32 %v490_v40, %v420_v39 }
 0x12b   : > { %v538_v46 = vpop.f32.mrf.mxu2 }
 0x12c   : > { %v558_v41 = vpop.f32.mrf.mxu3  ;;  %v561_v53 = vmul.f32 %v1928_v38, %v538_v46 }
 0x12d   : > { %v562_v45 = vmul.f32 %v1923_v32, %v558_v41  ;;  %v630_v47 = vpop.f32.mrf.mxu1  ;;  %v610_v50 = vpop.f32.mrf.mxu0 }
 0x12e   : > { %v563_v58 = vadd.f32 %v561_v53, %v491_v52  ;;  %v1630_v52 = vld [vmem:[%s2055_s4 + $0x8] sm:$0xf] }
 0x12f   : > { %v564_v51 = vadd.f32 %v562_v45, %v492_v44 }
 0x130   : > { %v633_v0 = vadd.f32 %v610_v50, %v563_v58  ;;  %v1478_v58 = vld [vmem:[%s2056_s5] sm:$0xf] }
 0x131   : > { %v634_v55 = vadd.f32 %v630_v47, %v564_v51  ;;  %v1627_v51 = vld [vmem:[%s2055_s4 + $0x4] sm:$0xf] }
 0x13b   : > { %v700_v54 = vpop.f32.mrf.mxu3  ;;  %v680_v57 = vpop.f32.mrf.mxu2 }
 0x13c   : > { %v704_v56 = vmul.f32 %v1926_v37, %v700_v54  ;;  %v703_v60 = vmul.f32 %v1932_v43, %v680_v57  ;;  %v1494_v54 = vld.sshfl [vmem:[#allocation1 + $0x8] sm:$0xff pattern:$0x75316420] }
 0x13d   : > { %v772_v59 = vpop.f32.mrf.mxu1  ;;  %v752_v63 = vpop.f32.mrf.mxu0 }
 0x13e   : > { %v706_v61 = vadd.f32 %v704_v56, %v634_v55  ;;  %v776_v62 = vmul.f32 %v1923_v32, %v772_v59  ;;  %v705_v1 = vadd.f32 %v703_v60, %v633_v0  ;;  %v775_v2 = vmul.f32 %v1928_v38, %v752_v63  ;;  %v1495_v55 = vld.sshfl [vmem:[#allocation1 + $0x10] sm:$0xff pattern:$0x75316420] }
 0x140   : > { %v778_v3 = vadd.f32 %v776_v62, %v706_v61  ;;  %v777_v6 = vadd.f32 %v775_v2, %v705_v1 }
 0x14b   : > { %v824_v4 = vpop.f32.mrf.mxu2  ;;  %v844_v5 = vpop.f32.mrf.mxu3 }
 0x14c   : > { %v848_v7 = vadd.f32 %v844_v5, %v778_v3  ;;  %v847_v10 = vadd.f32 %v824_v4, %v777_v6  ;;  %v1633_v6 = vld [vmem:[%s2055_s4 + $0xc] sm:$0xf] }
 0x14d   : > { %v894_v8 = vpop.f32.mrf.mxu0  ;;  %v914_v9 = vpop.f32.mrf.mxu1 }
 0x14e   : > { %v917_v11 = vmul.f32 %v1932_v43, %v894_v8  ;;  %v918_v12 = vmul.f32 %v1926_v37, %v914_v9 }
 0x150   : > { %v919_v14 = vadd.f32 %v917_v11, %v847_v10  ;;  %v920_v15 = vadd.f32 %v918_v12, %v848_v7  ;;  %v1636_v7 = vld [vmem:[%s2055_s4 + $0x10] sm:$0xf]  ;;  %v1493_v11 = vld.sshfl [vmem:[#allocation1] sm:$0xff pattern:$0x75316420] }
 0x152   : > { %v927_v17 = vadd.f32 %v925_v13, %v919_v14  ;;  %v928_v18 = vadd.f32 %v925_v13, %v920_v15  ;;  %v1639_v14 = vld [vmem:[%s2055_s4 + $0x14] sm:$0xf]  ;;  %v1642_v15 = vld [vmem:[%s2055_s4 + $0x18] sm:$0xf] }
 0x154   : > { %vm931_vm1 = vcmp.ge.f32.partialorder %v928_v18, 0.0  ;;  %v934_v19 = vmul.f32 %v932_v16, %v928_v18  ;;  %vm930_vm10 = vcmp.ge.f32.partialorder %v927_v17, 0.0  ;;  %v933_v20 = vmul.f32 %v932_v16, %v927_v17 }
 0x156   : > { %v936_v21 = vsel %vm931_vm1, %v928_v18, %v934_v19  ;;  %v935_v22 = vsel %vm930_vm10, %v927_v17, %v933_v20 }
 0x157   : > { %945 = vrot.lane.b32.xlu2 %v936_v21, %s1734_s18  ;;  %943 = vrot.lane.b32.xlu1 %v935_v22, %s1734_s18 }
 0x1b1   : > { %v946_v23 = vpop.permute.xlu2 %945 }
 0x1b2   : > { %954 = vst.msk [vmem:[#allocation2 + $0x10] sm:$0xff] %vm937_vm15, %v946_v23 }
 0x1b9   : > { %v1010_v27 = vld [vmem:[#allocation2 + $0x10] sm:$0xff] }
 0x1c9   : > { %v944_v24 = vpop.permute.xlu1 %943 }
 0x1ca   : > { %v947_v25 = vsel %vm937_vm15, %v944_v24, %v946_v23  ;;  %952 = vst.msk [vmem:[#allocation2] sm:$0xff] %vm951_vm11, %v944_v24 }
 0x1cb   : > { %997 = vmatpush.msra.mxu3 %v947_v25  ;;  %v1685_v28 = vpack.i.bf16 %v1010_v27, %v947_v25  ;;  %v1648_v27 = vld [vmem:[%s2055_s4 + $0x20] sm:$0xf] }
 0x1cc   : > { %1626 = vmatmul.msk.f32.vlgmr.msra.gmra.mxu3 %vm958_vm12, %v955_v29 }
 0x1d1   : > { %v1008_v26 = vld [vmem:[#allocation2] sm:$0xff] }
 0x1d2   : > { %1189 = vrot.lane.b32.xlu0 %v1008_v26, %s1727_s7  ;;  %1014 = vrot.lane.b32.xlu1 %v1008_v26, %s1724_s28 }
 0x1d3   : > { %1071 = vrot.lane.b32.xlu2 %v1008_v26, %s1725_s29  ;;  %977 = vmatpush.msra.mxu2 %v1008_v26 }
 0x1d4   : > { %1625 = vmatmul.msk.f32.vlgmr.msra.gmra.mxu2 %vm958_vm12, %v955_v29 }
 0x1da   : > { %1681 = vrot.lane.b32.xlu0 %v1685_v28, %s1724_s28  ;;  %1676 = vrot.lane.b32.xlu1 %v1685_v28, %s1725_s29  ;;  %s252_s28 = scalar_lea.vmem %s2057_s6, %s1653_s16 }
 0x1db   : > { %1686 = vrot.lane.b32.xlu2 %v1685_v28, %s1727_s7 }
 0x1e2   : > { %1696 = vrot.lane.b32.xlu0 %v1685_v28, %s1729_s9  ;;  %1691 = vrot.lane.b32.xlu1 %v1685_v28, %s1726_s30 }
 0x1e3   : > { %1130 = vrot.lane.b32.xlu2 %v1008_v26, %s1726_s30 }
 0x1ea   : > { %1246 = vrot.lane.b32.xlu0 %v1008_v26, %s1728_s8  ;;  %1305 = vrot.lane.b32.xlu1 %v1008_v26, %s1729_s9 }
 0x1eb   : > { %1701 = vrot.lane.b32.xlu2 %v1685_v28, %s1728_s8 }
 0x1f2   : > { %1711 = vrot.lane.b32.xlu0 %v1685_v28, %s1730_s10  ;;  %1706 = vrot.lane.b32.xlu1 %v1685_v28, %s1731_s11 }
 0x1f3   : > { %1421 = vrot.lane.b32.xlu2 %v1008_v26, %s1731_s11 }
 0x1fa   : > { %1364 = vrot.lane.b32.xlu1 %v1008_v26, %s1730_s10  ;;  %1498 = vrot.lane.b32.xlu0 %v1494_v54, %s1727_s7  ;;  %v1645_v26 = vld [vmem:[%s2055_s4 + $0x1c] sm:$0xf] }
 0x1fb   : > { %1481 = vperm.xlu2 %1715, %v1478_v58  }
 0x202   : > { %1500 = vrot.lane.b32.xlu1 %v1495_v55, %s1727_s7 }
 0x203   : > { %1496 = vrot.lane.b32.xlu2 %v1493_v11, %s1727_s7 }
 0x22d   : > { %v1072_v30 = vpop.permute.xlu2 %1071 }
 0x235   : > { %v1687_v31 = vpop.permute.xlu2 %1686 }
 0x236   : > { %v1689_v45 = vunpack.i.h.bf16 %v1687_v31  ;;  %v1688_v46 = vunpack.i.l.bf16 %v1687_v31 }
 0x238   : > { %v1196_v57 = vsel %vm583_vm5, %v1688_v46, %v1689_v45 }
 0x23d   : > { %v1131_v35 = vpop.permute.xlu2 %1130 }
 0x244   : > { %v1190_v33 = vpop.permute.xlu0 %1189  ;;  %v1015_v34 = vpop.permute.xlu1 %1014 }
 0x245   : > { %v1702_v53 = vpop.permute.xlu2 %1701  ;;  %v1195_v56 = vsel %vm583_vm5, %v1190_v33, %v1688_v46 }
 0x246   : > { %v1704_v59 = vunpack.i.h.bf16 %v1702_v53  ;;  %v1703_v60 = vunpack.i.l.bf16 %v1702_v53 }
 0x248   : > { %v1253_v8 = vsel %vm653_vm6, %v1703_v60, %v1704_v59 }
 0x24c   : > { %v1682_v36 = vpop.permute.xlu0 %1681  ;;  %v1677_v39 = vpop.permute.xlu1 %1676 }
 0x24d   : > { %v1684_v40 = vunpack.i.h.bf16 %v1682_v36  ;;  %v1683_v41 = vunpack.i.l.bf16 %v1682_v36  ;;  %v1679_v42 = vunpack.i.h.bf16 %v1677_v39  ;;  %v1678_v44 = vunpack.i.l.bf16 %v1677_v39  ;;  %v1422_v22 = vpop.permute.xlu2 %1421 }
 0x24f   : > { %v1020_v47 = vsel %vm369_vm3, %v1015_v34, %v1683_v41  ;;  %v1021_v48 = vsel %vm369_vm3, %v1683_v41, %v1684_v40  ;;  %v1077_v49 = vsel %vm439_vm2, %v1072_v30, %v1678_v44  ;;  %v1078_v50 = vsel %vm439_vm2, %v1678_v44, %v1679_v42  ;;  %v999_v31 = vpop.f32.mrf.mxu3 }
 0x250   : > { %1042 = vmatpush.msrb.mxu0 %v1020_v47  ;;  %1062 = vmatpush.msrb.mxu1 %v1021_v48  ;;  %v1003_v42 = vmul.f32 %v1923_v32, %v999_v31 }
 0x251   : > { %1099 = vmatpush.msrb.mxu2 %v1077_v49  ;;  %1119 = vmatpush.msrb.mxu3 %v1078_v50 }
 0x252   : > { %1628 = vmatmul.msk.f32.vlgmr.msrb.gmra.mxu0 %vm958_vm12, %v1627_v51  ;;  %1629 = vmatmul.msk.f32.vlgmr.msrb.gmra.mxu1 %vm958_vm12, %v1627_v51 }
 0x253   : > { %1631 = vmatmul.msk.f32.vlgmr.msrb.gmra.mxu2 %vm958_vm12, %v1630_v52  ;;  %1632 = vmatmul.msk.f32.vlgmr.msrb.gmra.mxu3 %vm958_vm12, %v1630_v52 }
 0x254   : > { %1217 = vmatpush.msra.mxu2 %v1195_v56  ;;  %1237 = vmatpush.msra.mxu3 %v1196_v57  ;;  %v1697_v61 = vpop.permute.xlu0 %1696  ;;  %v1692_v62 = vpop.permute.xlu1 %1691 }
 0x255   : > { %v1699_v63 = vunpack.i.h.bf16 %v1697_v61  ;;  %v1698_v0 = vunpack.i.l.bf16 %v1697_v61  ;;  %v1694_v1 = vunpack.i.h.bf16 %v1692_v62  ;;  %v1693_v2 = vunpack.i.l.bf16 %v1692_v62 }
 0x257   : > { %v1136_v3 = vsel %vm511_vm4, %v1131_v35, %v1693_v2  ;;  %v1137_v4 = vsel %vm511_vm4, %v1693_v2, %v1694_v1  ;;  %v1312_v5 = vsel %vm725_vm7, %v1698_v0, %v1699_v63  ;;  %v979_v30 = vpop.f32.mrf.mxu2  ;;  %v1482_v2 = vpop.permute.xlu2 %1481 }
 0x258   : > { %1158 = vmatpush.msra.mxu0 %v1136_v3  ;;  %1178 = vmatpush.msra.mxu1 %v1137_v4  ;;  %v1002_v41 = vmul.f32 %v1928_v38, %v979_v30 }
 0x259   : > { %1353 = vmatpush.msrb.mxu3 %v1312_v5 }
 0x25a   : > { %1294 = vmatpush.msrb.mxu1 %v1253_v8  ;;  %1634 = vmatmul.msk.f32.vlgmr.msra.gmra.mxu0 %vm958_vm12, %v1633_v6 }
 0x25b   : > { %1635 = vmatmul.msk.f32.vlgmr.msra.gmra.mxu1 %vm958_vm12, %v1633_v6  ;;  %1637 = vmatmul.msk.f32.vlgmr.msra.gmra.mxu2 %vm958_vm12, %v1636_v7 }
 0x25c   : > { %1638 = vmatmul.msk.f32.vlgmr.msra.gmra.mxu3 %vm958_vm12, %v1636_v7  ;;  %v1247_v9 = vpop.permute.xlu0 %1246  ;;  %v1306_v10 = vpop.permute.xlu1 %1305 }
 0x25d   : > { %v1252_v12 = vsel %vm653_vm6, %v1247_v9, %v1703_v60  ;;  %v1311_v13 = vsel %vm725_vm7, %v1306_v10, %v1698_v0 }
 0x25e   : > { %1274 = vmatpush.msrb.mxu0 %v1252_v12  ;;  %1333 = vmatpush.msrb.mxu2 %v1311_v13 }
 0x262   : > { %1640 = vmatmul.msk.f32.vlgmr.msrb.gmra.mxu0 %vm958_vm12, %v1639_v14 }
 0x263   : > { %1641 = vmatmul.msk.f32.vlgmr.msrb.gmra.mxu1 %vm958_vm12, %v1639_v14  ;;  %1643 = vmatmul.msk.f32.vlgmr.msrb.gmra.mxu2 %vm958_vm12, %v1642_v15 }
 0x264   : > { %1644 = vmatmul.msk.f32.vlgmr.msrb.gmra.mxu3 %vm958_vm12, %v1642_v15  ;;  %v1712_v16 = vpop.permute.xlu0 %1711  ;;  %v1707_v17 = vpop.permute.xlu1 %1706 }
 0x265   : > { %v1714_v18 = vunpack.i.h.bf16 %v1712_v16  ;;  %v1713_v19 = vunpack.i.l.bf16 %v1712_v16  ;;  %v1709_v20 = vunpack.i.h.bf16 %v1707_v17  ;;  %v1708_v21 = vunpack.i.l.bf16 %v1707_v17  ;;  %v1497_v17 = vpop.permute.xlu2 %1496 }
 0x267   : > { %v1371_v23 = vsel %vm797_vm8, %v1713_v19, %v1714_v18  ;;  %v1427_v24 = vsel %vm867_vm9, %v1422_v22, %v1708_v21  ;;  %v1428_v25 = vsel %vm867_vm9, %v1708_v21, %v1709_v20 }
 0x268   : > { %1412 = vmatpush.msra.mxu1 %v1371_v23  ;;  %1449 = vmatpush.msra.mxu2 %v1427_v24 }
 0x269   : > { %1469 = vmatpush.msra.mxu3 %v1428_v25 }
 0x26b   : > { %1647 = vmatmul.msk.f32.vlgmr.msra.gmra.mxu1 %vm958_vm12, %v1645_v26  ;;  %1649 = vmatmul.msk.f32.vlgmr.msra.gmra.mxu2 %vm958_vm12, %v1648_v27 }
 0x26c   : > { %1650 = vmatmul.msk.f32.vlgmr.msra.gmra.mxu3 %vm958_vm12, %v1648_v27  ;;  %v1365_v28 = vpop.permute.xlu1 %1364  ;;  %v1499_v15 = vpop.permute.xlu0 %1498 }
 0x26d   : > { %v1370_v29 = vsel %vm797_vm8, %v1365_v28, %v1713_v19  ;;  %v1502_v21 = vsel %vm583_vm5, %v1497_v17, %v1499_v15 }
 0x26e   : > { %1392 = vmatpush.msra.mxu0 %v1370_v29 }
 0x26f   : > { %1646 = vmatmul.msk.f32.vlgmr.msra.gmra.mxu0 %vm958_vm12, %v1645_v26 }
 0x2cf   : > { %v1044_v33 = vpop.f32.mrf.mxu0  ;;  %v1064_v34 = vpop.f32.mrf.mxu1 }
 0x2d0   : > { %v1067_v48 = vadd.f32 %v1044_v33, %v1002_v41  ;;  %v1068_v49 = vadd.f32 %v1064_v34, %v1003_v42 }
 0x2d6   : > { %v1101_v35 = vpop.f32.mrf.mxu2  ;;  %v1121_v36 = vpop.f32.mrf.mxu3 }
 0x2d7   : > { %v1160_v39 = vpop.f32.mrf.mxu0  ;;  %v1124_v44 = vmul.f32 %v1932_v43, %v1101_v35  ;;  %v1125_v45 = vmul.f32 %v1926_v37, %v1121_v36 }
 0x2d8   : > { %v1180_v40 = vpop.f32.mrf.mxu1  ;;  %v1183_v52 = vmul.f32 %v1928_v38, %v1160_v39 }
 0x2d9   : > { %v1126_v50 = vadd.f32 %v1124_v44, %v1067_v48  ;;  %v1127_v51 = vadd.f32 %v1125_v45, %v1068_v49  ;;  %v1184_v53 = vmul.f32 %v1923_v32, %v1180_v40 }
 0x2db   : > { %v1185_v56 = vadd.f32 %v1183_v52, %v1126_v50  ;;  %v1186_v57 = vadd.f32 %v1184_v53, %v1127_v51 }
 0x2de   : > { %v1219_v46 = vpop.f32.mrf.mxu2 }
 0x2df   : > { %v1239_v47 = vpop.f32.mrf.mxu3  ;;  %v1276_v54 = vpop.f32.mrf.mxu0  ;;  %v1242_v62 = vadd.f32 %v1219_v46, %v1185_v56 }
 0x2e0   : > { %v1296_v55 = vpop.f32.mrf.mxu1  ;;  %v1299_v58 = vmul.f32 %v1932_v43, %v1276_v54  ;;  %v1243_v63 = vadd.f32 %v1239_v47, %v1186_v57 }
 0x2e1   : > { %v1300_v59 = vmul.f32 %v1926_v37, %v1296_v55 }
 0x2e2   : > { %v1301_v3 = vadd.f32 %v1299_v58, %v1242_v62 }
 0x2e3   : > { %v1302_v4 = vadd.f32 %v1300_v59, %v1243_v63 }
 0x2e6   : > { %v1335_v60 = vpop.f32.mrf.mxu2 }
 0x2e7   : > { %v1355_v61 = vpop.f32.mrf.mxu3  ;;  %v1358_v0 = vmul.f32 %v1928_v38, %v1335_v60  ;;  %v1501_v38 = vpop.permute.xlu1 %1500 }
 0x2e8   : > { %v1359_v1 = vmul.f32 %v1923_v32, %v1355_v61  ;;  %v1414_v7 = vpop.f32.mrf.mxu1  ;;  %v1503_v18 = vsel %vm583_vm5, %v1499_v15, %v1501_v38 }
 0x2e9   : > { %v1360_v6 = vadd.f32 %v1358_v0, %v1301_v3 }
 0x2ea   : > { %v1361_v5 = vadd.f32 %v1359_v1, %v1302_v4 }
 0x2ec   : > { %v1394_v8 = vpop.f32.mrf.mxu0  ;;  %v1418_v12 = vadd.f32 %v1414_v7, %v1361_v5 }
 0x2ed   : > { %v1417_v9 = vadd.f32 %v1394_v8, %v1360_v6 }
 0x2ee   : > { %v1451_v10 = vpop.f32.mrf.mxu2 }
 0x2ef   : > { %v1471_v11 = vpop.f32.mrf.mxu3  ;;  %v1474_v13 = vmul.f32 %v1932_v43, %v1451_v10 }
 0x2f0   : > { %v1475_v14 = vmul.f32 %v1926_v37, %v1471_v11 }
 0x2f1   : > { %v1476_v16 = vadd.f32 %v1474_v13, %v1417_v9 }
 0x2f2   : > { %v1477_v32 = vadd.f32 %v1475_v14, %v1418_v12 }
 0x2f3   : > { %v1484_v19 = vadd.f32 %v1482_v2, %v1476_v16 }
 0x2f4   : > { %v1485_v20 = vadd.f32 %v1482_v2, %v1477_v32 }
 0x2f5   : > { %v1506_v23 = vadd.f32 %v1502_v21, %v1484_v19 }
 0x2f6   : > { %v1507_v22 = vadd.f32 %v1503_v18, %v1485_v20 }
 0x2f8   : > { %v1510_v43 = vrot.slane %v1507_v22, 4 }
 0x2fa   : > { %v1511_v37 = vsel %vm302_vm0, %v1506_v23, %v1510_v43 }
 0x2fb   : > { %1513 = vst [vmem:[%s252_s28] sm:$0xff] %v1511_v37 }
 0x2fc PF: > { %s17_s23 = sadd.s32 1, %s1722_s23  }
 0x2fd   : > { %p14_p4 = scmp.ge.s32.totalorder %s17_s23, 4  }
 0x2ff   :  { %16 = sbr.rel (!%p14_p4) target bundleno = 2 (0x2), region = 99 }

</bundles_post_ra>
